<compile_context>
chip_gen: v5e
topology: v5e:2x2
jax: 0.10.0
libtpu: 0.0.40
codegen_flags: <defaults>
</compile_context>

<pallas_src>
import jax
import jax.numpy as jnp
from jax.experimental import pallas as pl
from jax.experimental.pallas import tpu as pltpu


# ----------------------------------------------------------------------------
# Fused kernel: one row band = 3x3 conv (single K=9*Cin matmul) + bias + ReLU
# + 1x1 detect head.  Interior pixels only; channels-major; pixels on lanes.
# ----------------------------------------------------------------------------
def _fused_detect_kernel(x_ref, w1_ref, b1_ref, w2_ref, b2_ref, o_ref):
    # x_ref : (Cin, Hp, Wp)   bf16  zero-padded image (rows=sublanes, cols=lanes)
    # w1_ref: (Chid, 9*Cin)   bf16  3x3 taps, tap-major columns (t = dy*3 + dx)
    # b1_ref: (Chid, 1)       f32
    # w2_ref: (Cdet, Chid)    bf16
    # b2_ref: (Cdet, 1)       f32
    # o_ref : (Cdet, TR, W)   f32   interior rows only (no padding ring)
    cdet, tr, w = o_ref.shape
    cin = x_ref.shape[0]

    # Interior rows [j*TR, j*TR+TR) need padded rows [j*TR, j*TR+TR+2).
    row0 = pl.program_id(1) * tr
    if tr % 8 == 0:
        row0 = pl.multiple_of(row0, 8)          # sublane-aligned dynamic slice
    band = x_ref[:, pl.ds(row0, tr + 2), :]     # (Cin, TR+2, Wp)

    # Hoist the 3 dx lane shifts once per tile; reuse across dy (dy is then a
    # cheap sublane offset, not another lane rotation).
    shifted = [band[:, :, dx:dx + w] for dx in range(3)]       # 3 x (Cin, TR+2, W)

    # In-register im2col: (9*Cin, TR, W) -> one K=9*Cin MXU push instead of
    # nine K=Cin pushes with a 9-deep dependent accumulate chain.
    patches = jnp.concatenate(
        [shifted[dx][:, dy:dy + tr, :] for dy in range(3) for dx in range(3)],
        axis=0,
    ).reshape(9 * cin, tr * w)                                 # bf16

    acc = jnp.dot(w1_ref[...], patches,
                  preferred_element_type=jnp.float32)          # (Chid, TR*W) f32
    feat = jnp.maximum(acc + b1_ref[...], 0.0)                 # f32 epilogue (v5e-safe)
    pred = jnp.dot(w2_ref[...], feat.astype(jnp.bfloat16),     # fused 1x1 detect head
                   preferred_element_type=jnp.float32) + b2_ref[...]
    o_ref[...] = pred.reshape(cdet, tr, w).astype(o_ref.dtype)


# ----------------------------------------------------------------------------
# Row-band size: multiple of 8 dividing H (or H itself), ~<=4096 pixels/tile so
# the f32 acc / output tiles stay small on every generation (incl. v7x 64 MiB).
# ----------------------------------------------------------------------------
def _pick_block_rows(h, w, block_rows):
    def valid(tr):
        return h % tr == 0 and (tr % 8 == 0 or tr == h)

    if block_rows is not None and valid(block_rows):
        return block_rows
    best = None
    for tr in range(8, h + 1, 8):
        if h % tr == 0 and tr * w <= 4096:
            best = tr
    if best is None:
        for tr in range(8, h + 1, 8):
            if h % tr == 0:
                best = tr
                break
    return best if best is not None else h


# ----------------------------------------------------------------------------
# Wrapper: NCHW in -> NCHW out, one pallas_call for the whole forward pass.
# ----------------------------------------------------------------------------
def detect_only_wrapper(prep, x_nchw, *, block_rows=None, out_dtype=jnp.float32):
    """Equivalent of DetectOnlyWrapper.forward: returns only the detect head."""
    n, cin, h, w = x_nchw.shape
    hp, wp = h + 2, w + 2
    chid = prep["w1"].shape[0]
    cdet = prep["w2"].shape[0]

    tr = _pick_block_rows(h, w, block_rows)
    n_bands = h // tr

    # Single pad with the bf16 cast folded in front of it (no halo pad anymore).
    x_pad = jnp.pad(x_nchw.astype(jnp.bfloat16),
                    ((0, 0), (0, 0), (1, 1), (1, 1)))          # (N, Cin, Hp, Wp)

    flops = 2 * n * h * w * (chid * 9 * cin + cdet * chid)
    bytes_accessed = (x_pad.size * 2
                      + n * cdet * h * w * jnp.dtype(out_dtype).itemsize
                      + prep["w1"].size * 2 + prep["w2"].size * 2
                      + prep["b1"].size * 4 + prep["b2"].size * 4)

    return pl.pallas_call(
        _fused_detect_kernel,
        out_shape=jax.ShapeDtypeStruct((n, cdet, h, w), out_dtype),
        grid_spec=pltpu.PrefetchScalarGridSpec(
            num_scalar_prefetch=0,
            grid=(n, n_bands),
            in_specs=[
                # Whole padded image stays VMEM-resident across the row-band
                # axis (constant block index); input is ~10x smaller than the
                # output so this is cheap even at detector resolutions.
                pl.BlockSpec((None, cin, hp, wp), lambda i, j: (i, 0, 0, 0)),
                pl.BlockSpec(prep["w1"].shape, lambda i, j: (0, 0)),
                pl.BlockSpec(prep["b1"].shape, lambda i, j: (0, 0)),
                pl.BlockSpec(prep["w2"].shape, lambda i, j: (0, 0)),
                pl.BlockSpec(prep["b2"].shape, lambda i, j: (0, 0)),
            ],
            out_specs=pl.BlockSpec((None, cdet, tr, w), lambda i, j: (i, 0, j, 0)),
        ),
        compiler_params=pltpu.CompilerParams(
            dimension_semantics=("parallel", "parallel"),
            vmem_limit_bytes=32 * 1024 * 1024),
        cost_estimate=pl.CostEstimate(flops=flops, transcendentals=0,
                                      bytes_accessed=int(bytes_accessed)),
    )(x_pad, prep["w1"], prep["b1"], prep["w2"], prep["b2"])


# ----------------------------------------------------------------------------
# Params (PyTorch-style OIHW) + one-time conversion to the kernel layout.
# ----------------------------------------------------------------------------
def init_params(key, cin=3, chid=8, cdet=14):
    k1, k2, k3, k4 = jax.random.split(key, 4)
    return {
        "w1": jax.random.normal(k1, (chid, cin, 3, 3), jnp.float32) * 0.1,
        "b1": jax.random.normal(k2, (chid,), jnp.float32) * 0.1,
        "w2": jax.random.normal(k3, (cdet, chid, 1, 1), jnp.float32) * 0.1,
        "b2": jax.random.normal(k4, (cdet,), jnp.float32) * 0.1,
    }


def prepare_params(params):
    """One-time weight layout transform into the kernel's tap-major form."""
    chid, cin = params["w1"].shape[:2]
    cdet = params["w2"].shape[0]
    # (Chid, Cin, 3, 3) -> (Chid, 3, 3, Cin) -> (Chid, 9*Cin); column block
    # t = dy*3 + dx holds the Cin channels of tap (dy, dx).
    w1 = jnp.transpose(params["w1"], (0, 2, 3, 1)).reshape(chid, 9 * cin)
    return {
        "w1": w1.astype(jnp.bfloat16),
        "b1": params["b1"].reshape(chid, 1).astype(jnp.float32),
        "w2": params["w2"].reshape(cdet, chid).astype(jnp.bfloat16),
        "b2": params["b2"].reshape(cdet, 1).astype(jnp.float32),
    }


# ----------------------------------------------------------------------------
# Pure-JAX (f32) reference for validation.
# ----------------------------------------------------------------------------
def _ref_forward(params, x_nchw):
    feat = jax.lax.conv_general_dilated(
        x_nchw, params["w1"], window_strides=(1, 1), padding="SAME",
        dimension_numbers=("NCHW", "OIHW", "NCHW"))
    feat = jax.nn.relu(feat + params["b1"][None, :, None, None])
    pred = jax.lax.conv_general_dilated(
        feat, params["w2"], window_strides=(1, 1), padding="VALID",
        dimension_numbers=("NCHW", "OIHW", "NCHW"))
    return pred + params["b2"][None, :, None, None]


if __name__ == "__main__":
    key = jax.random.PRNGKey(0)
    kx, kp = jax.random.split(key)

    # Small analogue of the original (1, 3, H, W) -> (1, 14, H, W) pipeline.
    x = jax.random.normal(kx, (2, 3, 16, 16), jnp.float32)   # NCHW input
    params = init_params(kp, cin=3, chid=8, cdet=14)
    prep = prepare_params(params)                            # once, at init time

    ref = _ref_forward(params, x)

    # 1) Multi-band grid: (batch=2, row_bands=2), exercises the tiled pixel axis.
    fwd_banded = jax.jit(lambda p, xi: detect_only_wrapper(p, xi, block_rows=8))
    pred = jax.block_until_ready(fwd_banded(prep, x))
    assert pred.shape == (2, 14, 16, 16), pred.shape
    err = float(jnp.max(jnp.abs(pred - ref)))
    # bf16 matmul inputs with f32 accumulation -> loosened tolerance vs f32 ref.
    assert err < 5e-2, err

    # 2) Auto-picked band size (single band at this toy resolution).
    fwd_auto = jax.jit(lambda p, xi: detect_only_wrapper(p, xi))
    pred2 = jax.block_until_ready(fwd_auto(prep, x))
    err2 = float(jnp.max(jnp.abs(pred2 - ref)))
    assert err2 < 5e-2, err2

    print("KERNEL_OK")
</pallas_src>

<mosaic_0001>
module attributes {stable_mosaic.version = 11 : i64} {
  func.func @_fused_detect_kernel(%arg0: i32, %arg1: i32, %arg2: memref<1x3x18x18xbf16, #tpu.memory_space<vmem>>, %arg3: memref<8x27xbf16, #tpu.memory_space<vmem>>, %arg4: memref<8x1xf32, #tpu.memory_space<vmem>>, %arg5: memref<14x8xbf16, #tpu.memory_space<vmem>>, %arg6: memref<14x1xf32, #tpu.memory_space<vmem>>, %arg7: memref<1x14x8x16xf32, #tpu.memory_space<vmem>>) attributes {dimension_semantics = [#tpu.dimension_semantics<parallel>, #tpu.dimension_semantics<parallel>], iteration_bounds = array<i64: 2, 2>, scalar_prefetch = 0 : i64, scratch_operands = 0 : i64, tpu.core_type = #tpu.core_type<tc>, window_params = [{transform_indices = @transform_0, window_bounds = array<i64: 1, 3, 18, 18>}, {pipeline_mode = #tpu.pipeline_mode<synchronous>, transform_indices = @transform_1, window_bounds = array<i64: 8, 27>}, {pipeline_mode = #tpu.pipeline_mode<synchronous>, transform_indices = @transform_2, window_bounds = array<i64: 8, 1>}, {pipeline_mode = #tpu.pipeline_mode<synchronous>, transform_indices = @transform_3, window_bounds = array<i64: 14, 8>}, {pipeline_mode = #tpu.pipeline_mode<synchronous>, transform_indices = @transform_4, window_bounds = array<i64: 14, 1>}, {transform_indices = @transform_5, window_bounds = array<i64: 1, 14, 8, 16>}]} {
    %c8_i32 = arith.constant 8 : i32
    %0 = arith.muli %arg1, %c8_i32 : i32
    %1 = tpu.assume_multiple %0, 8 : i32
    %c0 = arith.constant 0 : index
    %c0_0 = arith.constant 0 : index
    %2 = arith.index_cast %1 : i32 to index
    %c0_1 = arith.constant 0 : index
    %3 = vector.load %arg2[%c0, %c0_0, %2, %c0_1] : memref<1x3x18x18xbf16, #tpu.memory_space<vmem>>, vector<1x3x10x18xbf16>
    %4 = vector.shape_cast %3 : vector<1x3x10x18xbf16> to vector<3x10x18xbf16>
    %5 = vector.extract_strided_slice %4 {offsets = [0, 0, 0], sizes = [3, 10, 16], strides = [1, 1, 1]} : vector<3x10x18xbf16> to vector<3x10x16xbf16>
    %6 = vector.extract_strided_slice %4 {offsets = [0, 0, 1], sizes = [3, 10, 16], strides = [1, 1, 1]} : vector<3x10x18xbf16> to vector<3x10x16xbf16>
    %7 = vector.extract_strided_slice %4 {offsets = [0, 0, 2], sizes = [3, 10, 16], strides = [1, 1, 1]} : vector<3x10x18xbf16> to vector<3x10x16xbf16>
    %8 = vector.extract_strided_slice %5 {offsets = [0, 0, 0], sizes = [3, 8, 16], strides = [1, 1, 1]} : vector<3x10x16xbf16> to vector<3x8x16xbf16>
    %9 = vector.extract_strided_slice %6 {offsets = [0, 0, 0], sizes = [3, 8, 16], strides = [1, 1, 1]} : vector<3x10x16xbf16> to vector<3x8x16xbf16>
    %10 = vector.extract_strided_slice %7 {offsets = [0, 0, 0], sizes = [3, 8, 16], strides = [1, 1, 1]} : vector<3x10x16xbf16> to vector<3x8x16xbf16>
    %11 = vector.extract_strided_slice %5 {offsets = [0, 1, 0], sizes = [3, 8, 16], strides = [1, 1, 1]} : vector<3x10x16xbf16> to vector<3x8x16xbf16>
    %12 = vector.extract_strided_slice %6 {offsets = [0, 1, 0], sizes = [3, 8, 16], strides = [1, 1, 1]} : vector<3x10x16xbf16> to vector<3x8x16xbf16>
    %13 = vector.extract_strided_slice %7 {offsets = [0, 1, 0], sizes = [3, 8, 16], strides = [1, 1, 1]} : vector<3x10x16xbf16> to vector<3x8x16xbf16>
    %14 = vector.extract_strided_slice %5 {offsets = [0, 2, 0], sizes = [3, 8, 16], strides = [1, 1, 1]} : vector<3x10x16xbf16> to vector<3x8x16xbf16>
    %15 = vector.extract_strided_slice %6 {offsets = [0, 2, 0], sizes = [3, 8, 16], strides = [1, 1, 1]} : vector<3x10x16xbf16> to vector<3x8x16xbf16>
    %16 = vector.extract_strided_slice %7 {offsets = [0, 2, 0], sizes = [3, 8, 16], strides = [1, 1, 1]} : vector<3x10x16xbf16> to vector<3x8x16xbf16>
    %17 = tpu.concatenate %8, %9, %10, %11, %12, %13, %14, %15, %16 in 0 : vector<3x8x16xbf16>, vector<3x8x16xbf16>, vector<3x8x16xbf16>, vector<3x8x16xbf16>, vector<3x8x16xbf16>, vector<3x8x16xbf16>, vector<3x8x16xbf16>, vector<3x8x16xbf16>, vector<3x8x16xbf16> -> vector<27x8x16xbf16>
    %18 = vector.shape_cast %17 : vector<27x8x16xbf16> to vector<27x128xbf16>
    %c0_2 = arith.constant 0 : index
    %c0_3 = arith.constant 0 : index
    %19 = vector.load %arg3[%c0_2, %c0_3] : memref<8x27xbf16, #tpu.memory_space<vmem>>, vector<8x27xbf16>
    %cst = arith.constant dense<0.000000e+00> : vector<8x128xf32>
    %20 = tpu.matmul %19, %18, %cst {dimension_numbers = #tpu.dot_dimension_numbers<[1], [0], [0], [1], [0, 0, 1, 1], [], []>} : vector<8x27xbf16>, vector<27x128xbf16>, vector<8x128xf32> -> vector<8x128xf32>
    %c0_4 = arith.constant 0 : index
    %c0_5 = arith.constant 0 : index
    %21 = vector.load %arg4[%c0_4, %c0_5] : memref<8x1xf32, #tpu.memory_space<vmem>>, vector<8x1xf32>
    %22 = vector.broadcast %21 : vector<8x1xf32> to vector<8x128xf32>
    %23 = arith.addf %20, %22 : vector<8x128xf32>
    %cst_6 = arith.constant 0.000000e+00 : f32
    %24 = vector.broadcast %cst_6 : f32 to vector<8x128xf32>
    %25 = arith.maximumf %23, %24 : vector<8x128xf32>
    %c0_7 = arith.constant 0 : index
    %c0_8 = arith.constant 0 : index
    %26 = vector.load %arg5[%c0_7, %c0_8] : memref<14x8xbf16, #tpu.memory_space<vmem>>, vector<14x8xbf16>
    %27 = arith.truncf %25 : vector<8x128xf32> to vector<8x128xbf16>
    %cst_9 = arith.constant dense<0.000000e+00> : vector<14x128xf32>
    %28 = tpu.matmul %26, %27, %cst_9 {dimension_numbers = #tpu.dot_dimension_numbers<[1], [0], [0], [1], [0, 0, 1, 1], [], []>} : vector<14x8xbf16>, vector<8x128xbf16>, vector<14x128xf32> -> vector<14x128xf32>
    %c0_10 = arith.constant 0 : index
    %c0_11 = arith.constant 0 : index
    %29 = vector.load %arg6[%c0_10, %c0_11] : memref<14x1xf32, #tpu.memory_space<vmem>>, vector<14x1xf32>
    %30 = vector.broadcast %29 : vector<14x1xf32> to vector<14x128xf32>
    %31 = arith.addf %28, %30 : vector<14x128xf32>
    %32 = vector.shape_cast %31 : vector<14x128xf32> to vector<14x8x16xf32>
    %c0_12 = arith.constant 0 : index
    %c0_13 = arith.constant 0 : index
    %c0_14 = arith.constant 0 : index
    %c0_15 = arith.constant 0 : index
    %33 = vector.load %arg7[%c0_12, %c0_13, %c0_14, %c0_15] : memref<1x14x8x16xf32, #tpu.memory_space<vmem>>, vector<1x14x8x16xf32>
    %34 = vector.shape_cast %33 : vector<1x14x8x16xf32> to vector<14x8x16xf32>
    %35 = vector.shape_cast %32 : vector<14x8x16xf32> to vector<1x14x8x16xf32>
    tpu.vector_store %arg7[%c0_12, %c0_13, %c0_14, %c0_15], %35 {strides = array<i32>} : memref<1x14x8x16xf32, #tpu.memory_space<vmem>>, vector<1x14x8x16xf32>,
    return
  }
  func.func @transform_0(%arg0: i32, %arg1: i32) -> (i32, i32, i32, i32) {
    %c0_i32 = arith.constant 0 : i32
    %c0_i32_0 = arith.constant 0 : i32
    %c0_i32_1 = arith.constant 0 : i32
    %c0_i32_2 = arith.constant 0 : i32
    return %arg0, %c0_i32, %c0_i32_0, %c0_i32_1 : i32, i32, i32, i32
  }
  func.func @transform_1(%arg0: i32, %arg1: i32) -> (i32, i32) {
    %c0_i32 = arith.constant 0 : i32
    %c0_i32_0 = arith.constant 0 : i32
    %c0_i32_1 = arith.constant 0 : i32
    return %c0_i32, %c0_i32_0 : i32, i32
  }
  func.func @transform_2(%arg0: i32, %arg1: i32) -> (i32, i32) {
    %c0_i32 = arith.constant 0 : i32
    %c0_i32_0 = arith.constant 0 : i32
    %c0_i32_1 = arith.constant 0 : i32
    return %c0_i32, %c0_i32_0 : i32, i32
  }
  func.func @transform_3(%arg0: i32, %arg1: i32) -> (i32, i32) {
    %c0_i32 = arith.constant 0 : i32
    %c0_i32_0 = arith.constant 0 : i32
    %c0_i32_1 = arith.constant 0 : i32
    return %c0_i32, %c0_i32_0 : i32, i32
  }
  func.func @transform_4(%arg0: i32, %arg1: i32) -> (i32, i32) {
    %c0_i32 = arith.constant 0 : i32
    %c0_i32_0 = arith.constant 0 : i32
    %c0_i32_1 = arith.constant 0 : i32
    return %c0_i32, %c0_i32_0 : i32, i32
  }
  func.func @transform_5(%arg0: i32, %arg1: i32) -> (i32, i32, i32, i32) {
    %c0_i32 = arith.constant 0 : i32
    %c0_i32_0 = arith.constant 0 : i32
    %c0_i32_1 = arith.constant 0 : i32
    return %arg0, %c0_i32, %arg1, %c0_i32_0 : i32, i32, i32, i32
  }
}

</mosaic_0001>

<bundles_post_ra>
// kernel: _lambda_.1
= control target key start
LH: loop header
LB: loop body
LE: loop exit
PB: predicated region body
PF: predicated region fallthrough
CT: control target
= control target key end

     0   :  { %10 = vsyncpa [#allocation3], 0  ;;  %s2079_s0 = inlined_call_operand.vmem [shape: bf16[2,3,18,18], index: 0, kind: input, shape index: {}]   ;;  %s2080_s1 = inlined_call_operand.vmem [shape: bf16[8,27], index: 1, kind: input, shape index: {}]   ;;  %s2081_s2 = inlined_call_operand.vmem [shape: f32[8,1], index: 2, kind: input, shape index: {}]   ;;  %s2082_s3 = inlined_call_operand.vmem [shape: bf16[14,8], index: 3, kind: input, shape index: {}]   ;;  %s2083_s4 = inlined_call_operand.vmem [shape: f32[14,1], index: 4, kind: input, shape index: {}]   ;;  %s2084_s5 = inlined_call_operand.hbm [shape: f32[2,14,16,16], index: 5, kind: output, shape index: {}]  }
   0x1   :  { %12 = vsyncpa [#allocation3 + $0x1], 0  ;;  %s1510_s18 = smov 0   ;;  %s1512_s19 = smov 0  }
   0x2   :  { %s1514_s20 = smov 0   ;;  %s1516_s21 = smov 0  }
   0x3   :  { %s1518_s22 = smov 0   ;;  %s1520_s23 = smov 0  }
   0x4   :  { %s1522_s24 = smov 0   ;;  %s1524_s25 = smov 0  }
   0x5 LB: > { %s1254_s26 = sadd.s32 4294967295, %s1462_s25   ;;  %s1255_s27 = sadd.s32 4294967294, %s1462_s25   ;;  %s1462_s25 = sphi %s1524_s25, %s18_s25   ;;  %s1458_s24 = sphi %s1522_s24, %s2106_s24   ;;  %s1454_s23 = sphi %s1520_s23, %s2105_s23   ;;  %s1450_s22 = sphi %s1518_s22, %s2104_s22   ;;  %s1446_s21 = sphi %s1516_s21, %s2103_s21   ;;  %s1442_s20 = sphi %s1514_s20, %s2102_s20   ;;  %s1438_s19 = sphi %s1512_s19, %s2101_s19   ;;  %s1434_s18 = sphi %s1510_s18, %s2100_s18  }
   0x6   : > { %s27_s28 = sadd.s32 1, %s1454_s23  ;;  %s30_s29 = sadd.s32 1, %s1458_s24 }
   0x7   : > { %p28_p0 = scmp.ge.s32.totalorder %s27_s28, 2  ;;  %p159_p1 = scmp.ne.s32.totalorder %s1442_s20, %s1438_s19 }
   0x8   : > { %p160_p2 = scmp.eq.s32.totalorder %s1254_s26, 3  ;;  %p165_p5 = scmp.ne.s32.totalorder %s1438_s19, %s1434_s18 }
   0x9   : > { %s2108_s28 = smov (%p28_p0, %s27_s28), 0  ;;  %s2110_s29 = smov (!%p28_p0, %s30_s29), %s1458_s24 }
   0xa   : > { %s145_s30 = ssub.s32 %s1454_s23, %s2108_s28  ;;  %p1561_p3 = por %p160_p2, %p159_p1 }
   0xb   : > { %p32_p4 = scmp.ge.s32.totalorder %s2110_s29, 2  ;;  %p166_p6 = scmp.eq.s32.totalorder %s1255_s27, 3 }
   0xc   : > { %p1258_p7 = scmp.ge.s32.totalorder %s1462_s25, 1  ;;  %p204_p9 = scmp.lt.s32.totalorder %s1462_s25, 5 }
   0xd   : > { %s2112_s29 = smov (%p32_p4, %s2110_s29), 0  ;;  %p1570_p8 = por %p166_p6, %p165_p5 }
   0xe   : > { %s144_s8 = ssub.s32 %s1458_s24, %s2112_s29  ;;  %s149_s9 = sadd.s32 1, %s1442_s20 }
   0xf   : > { %s146_s10 = sor.u32 %s145_s30, %s144_s8  ;;  %p205_p10 = pnand %p1258_p7, %p204_p9 }
  0x10   : > { %p147_p11 = scmp.eq.s32.totalorder %s146_s10, 0  ;;  %p232_p12 = scmp.lt.s32.totalorder (!%p205_p10), %s1450_s22, 1 }
  0x11   : > { %208 = sbr.rel (%p205_p10) target bundleno = 769 (0x301), region = 40  ;;  %s1260_s12 = sshll.u32 (!%p205_p10), %s1446_s21, 3 }
  0x12   : > { %s1579_s11 = scalar_select %p147_p11, %s1442_s20, %s149_s9  }
  0x13   : > { %s239_s13 = sshra.s32 (!%p205_p10), %s1260_s12, 3  ;;  %s1464_s8 = smov (!%p205_p10), 126  }
  0x14   : > { %s1261_s16 = sshll.u32 (!%p205_p10), %s239_s13, 2  ;;  %s1465_s9 = smov (!%p205_p10), 127  }
  0x15   : > { %s2085_s10 = smov (!%p205_p10), 16   ;;  %s1469_s12 = smov (!%p205_p10), 32  }
  0x16   : > { %s233_s14 = scalar_select %p232_p12, %s1450_s22, 1  ;;  %vm324_vm0 = vcmask 1042432   ;;  %vm325_vm1 = vcmask 1046532   ;;  %vm264_vm3 = vsmask.f32 3328  ;;  %vm454_vm6 = vcmask 1047556  }
  0x17   : > { %vm1587_vm2 = vmor %vm324_vm0, %vm325_vm1  ;;  %vm265_vm4 = vsmask.f32 7440  ;;  %v1466_v60 = vmov 1983009808   ;;  %s2089_s13 = smov 48   ;;  %s1474_s17 = smov 112  }
  0x18   : > { %s1276_s15 = smul.u32 36, %s233_s14  ;;  %vm1628_vm5 = vmor %vm264_vm3, %vm265_vm4  ;;  %v457_v61 = vunpack.c.l.s4 %v1466_v60  ;;  %s1471_s14 = smov 64   ;;  %vm782_vm7 = vcmask 130048   ;;  %vm789_vm8 = vcmask 261120   ;;  %vm794_vm9 = vcmask 392192  }
  0x19   : > { %vm799_vm10 = vcmask 523264   ;;  %vm831_vm11 = vcmask 1044480   ;;  %vm804_vm12 = vcmask 654336   ;;  %vm832_vm13 = vcmask 1045504  }
  0x1a   : > { %s236_s27 = scalar_lea.vmem %s2079_s0, %s1276_s15  ;;  %s1472_s15 = smov 80   ;;  %vm809_vm14 = vcmask 785408   ;;  %vm814_vm15 = vcmask 916480   ;;  %vm827_vm0 = vcmask 220160   ;;  %vm875_vm1 = vcmask 1043456  }
  0x1b   : > { %s242_s30 = scalar_lea.vmem %s236_s27, %s1261_s16  ;;  %s2087_s16 = smov 96  }
  0x1c   : > { %v1591_v1 = vld [vmem:[%s242_s30 + $0xc] sm:$0xf]  ;;  %v246_v2 = vld [vmem:[%s242_s30 + $0x10] sm:$0x1]  ;;  %v1593_v3 = vld [vmem:[%s242_s30] sm:$0xf] }
  0x1d   : > { %v1263_v4 = vrot.slane %v1591_v1, 9  ;;  %v333_v5 = vrot.slane %v246_v2, 5  ;;  %v244_v6 = vld [vmem:[%s242_s30 + $0x4] sm:$0x1]  ;;  %v1262_v7 = vrot.slane %v1593_v3, 9  ;;  %258 = vrot.lane.b32.xlu2 %v1593_v3, %s1464_s8  ;;  %v282_v8 = vshrl.u32 %v1591_v1, 16 }
  0x1e   : > { %v329_v9 = vrot.slane %v244_v6, 5  ;;  %v1600_v10 = vld [vmem:[%s242_s30 + $0x18] sm:$0xf]  ;;  %v248_v11 = vld [vmem:[%s242_s30 + $0x1c] sm:$0x1]  ;;  %v285_v12 = vshll.u32 %v1591_v1, 16 }
  0x1f   : > { %v1605_v13 = vsel %vm1587_vm2, %v1263_v4, %v333_v5  ;;  %v1264_v14 = vrot.slane %v1600_v10, 9  ;;  %v284_v15 = vrot.slane %v282_v8, 4  ;;  %v291_v19 = vshll.u32 %v246_v2, 16 }
  0x20   : > { %341 = vrot.lane.b32.xlu0 %v1605_v13, %s1465_s9  ;;  %v422_v16 = vshrl.u32 %v1605_v13, 16  ;;  %v1615_v17 = vsel %vm1587_vm2, %v1262_v7, %v329_v9  ;;  %v287_v18 = vrot.slane %v285_v12, 5  ;;  %v337_v22 = vrot.slane %v248_v11, 5 }
  0x21   : > { %339 = vrot.lane.b32.xlu1 %v1615_v17, %s1465_s9  ;;  %v419_v20 = vpack.i.b16 %v1605_v13, %v1615_v17  ;;  %v421_v21 = vshrl.u32 %v1615_v17, 16  ;;  %v296_v23 = vshrl.u32 %v1600_v10, 16  ;;  %v293_v25 = vrot.slane %v291_v19, 5 }
  0x22   : > { %v288_v24 = vor.u32 %v287_v18, %v284_v15  ;;  %v299_v26 = vshll.u32 %v1600_v10, 16  ;;  %v305_v27 = vshll.u32 %v248_v11, 16  ;;  %v338_v33 = vsel %vm1587_vm2, %v1264_v14, %v337_v22 }
  0x23   : > { %v1624_v28 = vpack.i.b16 %v422_v16, %v421_v21  ;;  %v298_v30 = vrot.slane %v296_v23, 4  ;;  %v268_v34 = vshrl.u32 %v1593_v3, 16  ;;  %v271_v38 = vshll.u32 %v1593_v3, 16 }
  0x24   : > { %v289_v31 = vrot.slane %v288_v24, 4  ;;  %v301_v32 = vrot.slane %v299_v26, 5  ;;  %v307_v37 = vrot.slane %v305_v27, 5  ;;  %v277_v48 = vshll.u32 %v244_v6, 16 }
  0x25   : > { %v270_v42 = vrot.slane %v268_v34, 4  ;;  %v273_v43 = vrot.slane %v271_v38, 5  ;;  %v429_v57 = vshrl.u32 %v338_v33, 16  ;;  %v1688_v5 = vunpack.c.0.s8 %v457_v61 }
  0x26   : > { %v1639_v35 = vsel %vm1628_vm5, %v289_v31, %v293_v25  ;;  %v302_v36 = vor.u32 %v301_v32, %v298_v30  ;;  %v279_v50 = vrot.slane %v277_v48, 5  ;;  %v1467_v26 = vmov 1934713408  }
  0x27   : > { %317 = vrot.lane.b32.xlu2 %v1639_v35, %s1464_s8  ;;  %v389_v40 = vshrl.u32 %v1639_v35, 16  ;;  %v274_v47 = vor.u32 %v273_v43, %v270_v42  ;;  %v471_v27 = vunpack.c.l.s4 %v1467_v26  ;;  %vm871_vm2 = vcmask 64512  }
  0x28   : > { %343 = vrot.lane.b32.xlu0 %v338_v33, %s1465_s9  ;;  %v303_v39 = vrot.slane %v302_v36, 4 }
  0x29   : > { %349 = vrot.lane.b32.xlu1 %v338_v33, %s1464_s8  ;;  %v275_v49 = vrot.slane %v274_v47, 4  ;;  %v1704_v43 = vunpack.c.0.s8 %v471_v27 }
  0x2a   : > { %v1649_v41 = vsel %vm1628_vm5, %v303_v39, %v307_v37 }
  0x2b   : > { %v387_v44 = vpack.i.b16 %v1649_v41, %v1639_v35  ;;  %v390_v45 = vshrl.u32 %v1649_v41, 16  ;;  %v1666_v51 = vsel %vm1628_vm5, %v275_v49, %v279_v50 }
  0x2d   : > { %v1656_v46 = vpack.i.b16 %v390_v45, %v389_v40 }
  0x2f   : > { %319 = vrot.lane.b32.xlu2 %v1649_v41, %s1464_s8 }
  0x30   : > { %345 = vrot.lane.b32.xlu0 %v1615_v17, %s1464_s8 }
  0x31   : > { %347 = vrot.lane.b32.xlu1 %v1605_v13, %s1464_s8 }
  0x37   : > { %315 = vrot.lane.b32.xlu2 %v1666_v51, %s1464_s8 }
  0x38   : > { %260 = vrot.lane.b32.xlu0 %v1591_v1, %s1464_s8 }
  0x39   : > { %313 = vrot.lane.b32.xlu1 %v1649_v41, %s1465_s9 }
  0x3f   : > { %256 = vrot.lane.b32.xlu2 %v1600_v10, %s1465_s9 }
  0x40   : > { %252 = vrot.lane.b32.xlu0 %v1593_v3, %s1465_s9 }
  0x41   : > { %254 = vrot.lane.b32.xlu1 %v1591_v1, %s1465_s9 }
  0x47   : > { %262 = vrot.lane.b32.xlu2 %v1600_v10, %s1464_s8 }
  0x48   : > { %309 = vrot.lane.b32.xlu0 %v1666_v51, %s1465_s9 }
  0x49   : > { %311 = vrot.lane.b32.xlu1 %v1639_v35, %s1465_s9 }
  0x77   : > { %v1686_v52 = vpop.permute.xlu2 %258 }
  0x81   : > { %v318_v53 = vpop.permute.xlu2 %317 }
  0x82   : > { %v413_v0 = vshrl.u32 %v318_v53, 16 }
  0x89   : > { %v320_v56 = vpop.permute.xlu2 %319 }
  0x8a   : > { %v411_v63 = vpack.i.b16 %v320_v56, %v318_v53  ;;  %v414_v4 = vshrl.u32 %v320_v56, 16  ;;  %v373_v53 = vshrl.u32 %v1686_v52, 16 }
  0x8c   : > { %v415_v16 = vpack.i.b16 %v414_v4, %v413_v0 }
  0x91   : > { %v1692_v25 = vpop.permute.xlu2 %315 }
  0x92   : > { %v342_v54 = vpop.permute.xlu0 %341  ;;  %v406_v61 = vshrl.u32 %v1692_v25, 16 }
  0x93   : > { %v340_v55 = vpop.permute.xlu1 %339  ;;  %v437_v9 = vshrl.u32 %v342_v54, 16 }
  0x94   : > { %v427_v58 = vpack.i.b16 %v340_v55, %v338_v33  ;;  %v430_v59 = vshrl.u32 %v340_v55, 16 }
  0x96   : > { %v566_v62 = vrot.slane %v427_v58, 4  ;;  %v431_v2 = vpack.i.b16 %v430_v59, %v429_v57 }
  0x98   : > { %v567_v6 = vsel %vm454_vm6, %v566_v62, %v411_v63  ;;  %v594_v15 = vrot.slane %v431_v2, 4 }
  0x99   : > { %v571_v19 = vperm.slane %v567_v6, %v1688_v5  ;;  %v1724_v0 = vpop.permute.xlu2 %256 }
  0x9a   : > { %v344_v7 = vpop.permute.xlu0 %343  ;;  %v595_v32 = vsel %vm454_vm6, %v594_v15, %v415_v16 }
  0x9b   : > { %v435_v11 = vpack.i.b16 %v344_v7, %v342_v54  ;;  %v438_v12 = vshrl.u32 %v344_v7, 16  ;;  %v350_v14 = vpop.permute.xlu1 %349  ;;  %v580_v36 = vrot.slane %v571_v19, 4  ;;  %v599_v13 = vperm.slane %v595_v32, %v1688_v5 }
  0x9c   : > { %v450_v18 = vshrl.u32 %v350_v14, 16  ;;  %v449_v24 = vpack.i.b16 0, %v350_v14 }
  0x9d   : > { %v439_v21 = vpack.i.b16 %v438_v12, %v437_v9  ;;  %v572_v22 = vrot.slane %v435_v11, 4  ;;  %v608_v60 = vrot.slane %v599_v13, 4  ;;  %v351_v12 = vpack.i.b16 %v1591_v1, %v1593_v3 }
  0x9e   : > { %v452_v31 = vpack.i.b16 0, %v450_v18  ;;  %v631_v38 = vperm.slane %v449_v24, %v1688_v5  ;;  %v1741_v18 = vpack.i.b16 %v282_v8, %v268_v34 }
  0x9f   : > { %v573_v29 = vsel %vm454_vm6, %v572_v22, %v419_v20  ;;  %v600_v30 = vrot.slane %v439_v21, 4 }
  0xa0   : > { %v577_v33 = vperm.slane %v573_v29, %v1688_v5  ;;  %v1708_v17 = vperm.slane %v452_v31, %v1688_v5  ;;  %v632_v54 = vrot.slane %v631_v38, 4 }
  0xa1   : > { %v601_v37 = vsel %vm454_vm6, %v600_v30, %v1624_v28 }
  0xa2   : > { %v578_v39 = vrot.slane %v577_v33, 4  ;;  %v605_v40 = vperm.slane %v601_v37, %v1688_v5  ;;  %v346_v42 = vpop.permute.xlu0 %345  ;;  %v581_v47 = vsel %vm454_vm6, %v577_v33, %v580_v36  ;;  %v658_v2 = vrot.slane %v1708_v17, 4 }
  0xa3   : > { %v444_v20 = vshrl.u32 %v346_v42, 16  ;;  %v348_v45 = vpop.permute.xlu1 %347  ;;  %v1719_v59 = vperm.slane %v581_v47, %v1704_v43 }
  0xa4   : > { %v606_v48 = vrot.slane %v605_v40, 4  ;;  %v443_v49 = vpack.i.b16 %v348_v45, %v346_v42  ;;  %v445_v28 = vshrl.u32 %v348_v45, 16  ;;  %v579_v50 = vsel %vm454_vm6, %v578_v39, %v571_v19 }
  0xa5   : > { %v1714_v55 = vperm.slane %v579_v50, %v1704_v43  ;;  %v609_v14 = vsel %vm454_vm6, %v605_v40, %v608_v60  ;;  %v366_v19 = vshrl.u32 %v1724_v0, 16  ;;  %v592_v21 = vrot.slane %v1719_v59, 4 }
  0xa6   : > { %v446_v56 = vpack.i.b16 %v445_v28, %v444_v20  ;;  %v626_v57 = vperm.slane %v443_v49, %v1688_v5  ;;  %v607_v58 = vsel %vm454_vm6, %v606_v48, %v599_v13  ;;  %v1749_v33 = vperm.slane %v609_v14, %v1704_v43 }
  0xa7   : > { %v613_v62 = vperm.slane %v607_v58, %v1704_v43  ;;  %v590_v63 = vrot.slane %v1714_v55, 4  ;;  %v732_v47 = vunpack.c.l.b16 %v1719_v59  ;;  %v593_v28 = vsel %vm454_vm6, 0, %v592_v21 }
  0xa8   : > { %v633_v4 = vsel %vm454_vm6, %v632_v54, %v626_v57  ;;  %v634_v6 = vrot.slane %v626_v57, 4  ;;  %v652_v7 = vperm.slane %v446_v56, %v1688_v5 }
  0xa9   : > { %v1730_v9 = vperm.slane %v633_v4, %v1704_v43  ;;  %v591_v11 = vsel %vm454_vm6, 0, %v590_v63  ;;  %v618_v27 = vrot.slane %v613_v62, 4  ;;  %v690_v31 = vunpack.c.l.b16 %v613_v62 }
  0xaa   : > { %v261_v15 = vpop.permute.xlu0 %260  ;;  %v659_v16 = vsel %vm454_vm6, %v658_v2, %v652_v7  ;;  %v635_v29 = vsel %vm454_vm6, %v631_v38, %v634_v6  ;;  %v660_v30 = vrot.slane %v652_v7, 4  ;;  %v704_v32 = vunpack.c.l.b16 %v591_v11 }
  0xab   : > { %v314_v22 = vpop.permute.xlu1 %313  ;;  %v665_v24 = vperm.slane %v659_v16, %v1704_v43  ;;  %v644_v26 = vrot.slane %v1730_v9, 4  ;;  %v371_v8 = vpack.i.b16 %v261_v15, %v1686_v52  ;;  %v374_v34 = vshrl.u32 %v261_v15, 16 }
  0xac   : > { %v405_v39 = vshrl.u32 %v314_v22, 16  ;;  %v643_v13 = vperm.slane %v635_v29, %v1704_v43  ;;  %v403_v20 = vpack.i.b16 %v1692_v25, %v314_v22  ;;  %v619_v45 = vsel %vm454_vm6, 0, %v618_v27 }
  0xad   : > { %v691_v36 = vunpack.c.l.b16 %v665_v24  ;;  %v645_v37 = vsel %vm454_vm6, 0, %v644_v26  ;;  %v670_v42 = vrot.slane %v665_v24, 4  ;;  %v746_v52 = vunpack.c.l.b16 %v1749_v33 }
  0xae   : > { %v705_v40 = vunpack.c.l.b16 %v645_v37  ;;  %v375_v50 = vpack.i.b16 %v374_v34, %v373_v53  ;;  %v460_v54 = vrot.slane %v371_v8, 4  ;;  %v661_v25 = vsel %vm454_vm6, %v1708_v17, %v660_v30 }
  0xaf   : > { %v693_v38 = vpack.c.b16 %v691_v36, %v690_v31  ;;  %v671_v49 = vsel %vm454_vm6, 0, %v670_v42  ;;  %v407_v57 = vpack.i.b16 %v406_v61, %v405_v39  ;;  %v718_v59 = vunpack.c.l.b16 %v619_v45 }
  0xb0   : > { %v707_v48 = vpack.c.b16 %v705_v40, %v704_v32  ;;  %v719_v56 = vunpack.c.l.b16 %v671_v49  ;;  %v1765_v60 = vperm.slane %v661_v25, %v1704_v43  ;;  %v646_v62 = vrot.slane %v643_v13, 4 }
  0xb1   : > { %696 = vrot.lane.b32.xlu0 %v693_v38, %s2085_s10  ;;  %v516_v63 = vrot.slane %v403_v20, 4  ;;  %v733_v6 = vunpack.c.l.b16 %v643_v13  ;;  %v488_v14 = vrot.slane %v375_v50, 4  ;;  %v544_v22 = vrot.slane %v407_v57, 4 }
  0xb2   : > { %710 = vrot.lane.b32.xlu1 %v707_v48, %s1469_s12  ;;  %v253_v58 = vpop.permute.xlu0 %252  ;;  %v721_v17 = vpack.c.b16 %v719_v56, %v718_v59  ;;  %v747_v61 = vunpack.c.l.b16 %v1765_v60  ;;  %v647_v21 = vsel %vm454_vm6, 0, %v646_v62  ;;  %v760_v36 = vunpack.c.l.b16 %v593_v28 }
  0xb3   : > { %v356_v53 = vpack.i.b16 %v253_v58, %v1600_v10  ;;  %v358_v2 = vshrl.u32 %v253_v58, 16  ;;  %v255_v4 = vpop.permute.xlu1 %254  ;;  %v735_v30 = vpack.c.b16 %v733_v6, %v732_v47  ;;  %v761_v32 = vunpack.c.l.b16 %v647_v21 }
  0xb4   : > { %v365_v7 = vshrl.u32 %v255_v4, 16  ;;  %v363_v11 = vpack.i.b16 %v1724_v0, %v255_v4  ;;  %724 = vrot.lane.b32.xlu2 %v721_v17, %s2089_s13  ;;  %v263_v0 = vpop.permute.xlu2 %262  ;;  %v749_v31 = vpack.c.b16 %v747_v61, %v746_v52  ;;  %v382_v39 = vshrl.u32 %v1666_v51, 16 }
  0xb5   : > { %v359_v15 = vpack.i.b16 %v358_v2, %v296_v23  ;;  %v461_v16 = vsel %vm454_vm6, %v460_v54, %v356_v53  ;;  %v379_v37 = vpack.i.b16 %v1666_v51, %v263_v0  ;;  %v517_v40 = vsel %vm454_vm6, %v516_v63, %v387_v44 }
  0xb6   : > { %v465_v24 = vperm.slane %v461_v16, %v1688_v5  ;;  %v367_v26 = vpack.i.b16 %v366_v19, %v365_v7  ;;  %v453_v27 = vrot.slane %v363_v11, 4  ;;  %v545_v1 = vsel %vm454_vm6, %v544_v22, %v1656_v46 }
  0xb7   : > { %v489_v29 = vsel %vm454_vm6, %v488_v14, %v359_v15  ;;  %v381_v42 = vshrl.u32 %v263_v0, 16  ;;  %v763_v51 = vpack.c.b16 %v761_v32, %v760_v36  ;;  %v521_v47 = vperm.slane %v517_v40, %v1688_v5 }
  0xb8   : > { %v466_v10 = vrot.slane %v465_v24, 4  ;;  %v1778_v23 = vperm.slane %v489_v29, %v1688_v5  ;;  %v455_v8 = vsel %vm454_vm6, %v453_v27, %v351_v12  ;;  %v482_v19 = vrot.slane %v367_v26, 4 }
  0xb9   : > { %v459_v34 = vperm.slane %v455_v8, %v1688_v5  ;;  %738 = vrot.lane.b32.xlu0 %v735_v30, %s1471_s14  ;;  %v383_v52 = vpack.i.b16 %v382_v39, %v381_v42  ;;  %v681_v54 = vunpack.c.l.b16 %v1730_v9  ;;  %v680_v58 = vunpack.c.l.b16 %v1714_v55 }
  0xba   : > { %v483_v3 = vsel %vm454_vm6, %v482_v19, %v1741_v18  ;;  %752 = vrot.lane.b32.xlu1 %v749_v31, %s1472_s15  ;;  %v310_v12 = vpop.permute.xlu0 %309  ;;  %v494_v35 = vrot.slane %v1778_v23, 4  ;;  %v549_v18 = vperm.slane %v545_v1, %v1688_v5  ;;  %v522_v59 = vrot.slane %v521_v47, 4 }
  0xbb   : > { %v468_v13 = vrot.slane %v459_v34, 4  ;;  %v312_v20 = vpop.permute.xlu1 %311  ;;  %v397_v38 = vshrl.u32 %v310_v12, 16  ;;  %v467_v45 = vsel %vm454_vm6, %v466_v10, %v459_v34  ;;  %v487_v41 = vperm.slane %v483_v3, %v1688_v5 }
  0xbc   : > { %v398_v44 = vshrl.u32 %v312_v20, 16  ;;  %v395_v46 = vpack.i.b16 %v312_v20, %v310_v12  ;;  %766 = vrot.lane.b32.xlu2 %v763_v51, %s2087_s16  ;;  %v473_v28 = vperm.slane %v467_v45, %v1704_v43  ;;  %v550_v62 = vrot.slane %v549_v18, 4 }
  0xbd   : > { %v469_v50 = vsel %vm454_vm6, %v465_v24, %v468_v13  ;;  %v495_v57 = vsel %vm454_vm6, %v494_v35, %v487_v41  ;;  %v1814_v6 = vpack.c.b16 %v681_v54, %v680_v58  ;;  %v496_v55 = vrot.slane %v487_v41, 4 }
  0xbe   : > { %v399_v48 = vpack.i.b16 %v398_v44, %v397_v38  ;;  %v510_v49 = vrot.slane %v395_v46, 4  ;;  %v1812_v2 = vperm.slane %v469_v50, %v1704_v43  ;;  %v478_v4 = vrot.slane %v473_v28, 4 }
  0xbf   : > { %v501_v11 = vperm.slane %v495_v57, %v1704_v43  ;;  %v620_v14 = vrot.slane %v1749_v33, 4  ;;  %v672_v15 = vrot.slane %v1765_v60, 4  ;;  %v678_v24 = vunpack.c.l.b16 %v473_v28 }
  0xc0   : > { %v538_v56 = vrot.slane %v399_v48, 4  ;;  %v511_v25 = vsel %vm454_vm6, %v510_v49, %v379_v37  ;;  %v479_v0 = vsel %vm454_vm6, 0, %v478_v4  ;;  %v730_v30 = vunpack.c.l.b16 %v1812_v2 }
  0xc1   : > { %v515_v63 = vperm.slane %v511_v25, %v1688_v5  ;;  %v688_v31 = vunpack.c.l.b16 %v501_v11  ;;  %v702_v34 = vunpack.c.l.b16 %v479_v0  ;;  %v506_v37 = vrot.slane %v501_v11, 4 }
  0xc2   : > { %v539_v53 = vsel %vm454_vm6, %v538_v56, %v383_v52  ;;  %v497_v3 = vsel %vm454_vm6, %v1778_v23, %v496_v55  ;;  %v673_v42 = vsel %vm454_vm6, 0, %v672_v15  ;;  %v621_v38 = vsel %vm454_vm6, 0, %v620_v14 }
  0xc3   : > { %v524_v9 = vrot.slane %v515_v63, 4  ;;  %v543_v7 = vperm.slane %v539_v53, %v1688_v5  ;;  %v523_v17 = vsel %vm454_vm6, %v522_v59, %v515_v63  ;;  %v507_v51 = vsel %vm454_vm6, 0, %v506_v37 }
  0xc4   : > { %v529_v61 = vperm.slane %v523_v17, %v1704_v43  ;;  %v505_v45 = vperm.slane %v497_v3, %v1704_v43  ;;  %v775_v23 = vunpack.c.l.b16 %v673_v42  ;;  %v480_v52 = vrot.slane %v1812_v2, 4  ;;  %v821_v17 = vld [vmem:[%s2081_s2] sm:$0xff] }
  0xc5   : > { %v552_v16 = vrot.slane %v543_v7, 4  ;;  %v525_v21 = vsel %vm454_vm6, %v521_v47, %v524_v9  ;;  %v551_v22 = vsel %vm454_vm6, %v550_v62, %v543_v7  ;;  %v774_v47 = vunpack.c.l.b16 %v621_v38  ;;  %v855_v38 = vld [vmem:[%s2083_s4 + $0x8] sm:$0x3f] }
  0xc6   : > { %v533_v26 = vperm.slane %v525_v21, %v1704_v43  ;;  %v557_v27 = vperm.slane %v551_v22, %v1704_v43  ;;  %v534_v29 = vrot.slane %v529_v61, 4  ;;  %v679_v32 = vunpack.c.l.b16 %v529_v61 }
  0xc7   : > { %v553_v33 = vsel %vm454_vm6, %v549_v18, %v552_v16  ;;  %v716_v18 = vunpack.c.l.b16 %v507_v51  ;;  %v744_v48 = vunpack.c.l.b16 %v505_v45  ;;  %v508_v49 = vrot.slane %v505_v45, 4 }
  0xc8   : > { %v731_v60 = vunpack.c.l.b16 %v533_v26  ;;  %v689_v10 = vunpack.c.l.b16 %v557_v27  ;;  %v535_v8 = vsel %vm454_vm6, 0, %v534_v29  ;;  %v562_v19 = vrot.slane %v557_v27, 4 }
  0xc9   : > { %v703_v36 = vunpack.c.l.b16 %v535_v8  ;;  %v1830_v39 = vpack.c.b16 %v679_v32, %v678_v24  ;;  %v561_v20 = vperm.slane %v553_v33, %v1704_v43  ;;  %v536_v46 = vrot.slane %v533_v26, 4 }
  0xca   : > { %v734_v40 = vpack.c.b16 %v731_v60, %v730_v30  ;;  %v692_v1 = vpack.c.b16 %v689_v10, %v688_v31  ;;  %v563_v13 = vsel %vm454_vm6, 0, %v562_v19  ;;  %v777_v28 = vpack.c.b16 %v775_v23, %v774_v47 }
  0xcb   : > { %v706_v12 = vpack.c.b16 %v703_v36, %v702_v34  ;;  %v717_v35 = vunpack.c.l.b16 %v563_v13  ;;  %v745_v41 = vunpack.c.l.b16 %v561_v20  ;;  %v564_v44 = vrot.slane %v561_v20, 4  ;;  %v820_v13 = vld [vmem:[%s2080_s1] sm:$0xf] }
  0xcc   : > { %736 = vrot.lane.b32.xlu1 %v734_v40, %s1471_s14  ;;  %694 = vrot.lane.b32.xlu0 %v692_v1, %s2085_s10  ;;  %v537_v25 = vsel %vm454_vm6, 0, %v536_v46  ;;  %v509_v57 = vsel %vm454_vm6, 0, %v508_v49  ;;  %v481_v58 = vsel %vm454_vm6, 0, %v480_v52  ;;  %v1475_v55 = vmov 0   ;;  %v854_v20 = vld [vmem:[%s2083_s4] sm:$0xff]  ;;  %s2097_s10 = smov 48  }
  0xcd   : > { %708 = vrot.lane.b32.xlu2 %v706_v12, %s1469_s12  ;;  %v720_v50 = vpack.c.b16 %v717_v35, %v716_v18  ;;  %v748_v54 = vpack.c.b16 %v745_v41, %v744_v48  ;;  %v565_v56 = vsel %vm454_vm6, 0, %v564_v44  ;;  %v759_v62 = vunpack.c.l.b16 %v537_v25  ;;  %1366 = vset.pattern.permute.xlu0 %v1475_v55  ;;  %v1268_v41 = vld [vmem:[%s2082_s3] sm:$0xf]  ;;  %v1274_v44 = vld [vmem:[%s2082_s3] sm:$0x70] }
  0xce   : > { %v773_v59 = vunpack.c.l.b16 %v565_v56  ;;  %v772_v63 = vunpack.c.l.b16 %v509_v57  ;;  %v758_v53 = vunpack.c.l.b16 %v481_v58  ;;  %1365 = vset.pattern.permute.xlu2 %v1475_v55  ;;  %1367 = vset.pattern.permute.xlu1 %v1475_v55  ;;  %v1476_v0 = vmov 65535  }
  0xcf   : > { %v833_v29 = vsel %vm831_vm11, 4294967295, %v1476_v0  ;;  %v1269_v18 = vor.u32 %v1274_v44, %v1268_v41 }
  0xd0   : > { %v776_v2 = vpack.c.b16 %v773_v59, %v772_v63  ;;  %v762_v4 = vpack.c.b16 %v759_v62, %v758_v53  ;;  %v834_v33 = vsel %vm832_vm13, %v833_v29, 0 }
  0xd4   : > { %780 = vrot.lane.b32.xlu1 %v777_v28, %s1474_s17  ;;  %722 = vrot.lane.b32.xlu0 %v720_v50, %s2089_s13  ;;  %s2098_s13 = smov 96  }
  0xd5   : > { %750 = vrot.lane.b32.xlu2 %v748_v54, %s1472_s15 }
  0xdc   : > { %778 = vrot.lane.b32.xlu1 %v776_v2, %s1474_s17  ;;  %764 = vrot.lane.b32.xlu0 %v762_v4, %s2087_s16  ;;  %s2099_s16 = smov 16  }
  0xdd   : > { %824 = vperm.xlu2 %1365, %v821_v17  }
  0xe4   : > { %858 = vperm.xlu0 %1366, %v854_v20   ;;  %863 = vperm.xlu1 %1367, %v855_v38  }
 0x10e   : > { %v725_v11 = vpop.permute.xlu2 %724 }
 0x116   : > { %v767_v16 = vpop.permute.xlu2 %766 }
 0x123   : > { %v697_v9 = vpop.permute.xlu0 %696 }
 0x124   : > { %v711_v7 = vpop.permute.xlu1 %710  ;;  %v788_v15 = vsel %vm782_vm7, %v1814_v6, %v697_v9 }
 0x125   : > { %v793_v21 = vsel %vm789_vm8, %v788_v15, %v711_v7 }
 0x126   : > { %v798_v26 = vsel %vm794_vm9, %v793_v21, %v725_v11 }
 0x127   : > { %v709_v30 = vpop.permute.xlu2 %708 }
 0x12b   : > { %v739_v61 = vpop.permute.xlu0 %738 }
 0x12c   : > { %v753_v14 = vpop.permute.xlu1 %752  ;;  %v803_v27 = vsel %vm799_vm10, %v798_v26, %v739_v61 }
 0x12d   : > { %v808_v6 = vsel %vm804_vm12, %v803_v27, %v753_v14 }
 0x12e   : > { %v813_v10 = vsel %vm809_vm14, %v808_v6, %v767_v16 }
 0x12f   : > { %v751_v40 = vpop.permute.xlu2 %750 }
 0x137   : > { %v825_v51 = vpop.permute.xlu2 %824 }
 0x13e   : > { %v737_v22 = vpop.permute.xlu1 %736  ;;  %v695_v24 = vpop.permute.xlu0 %694 }
 0x13f   : > { %v785_v31 = vsel %vm782_vm7, %v1830_v39, %v695_v24 }
 0x140   : > { %v791_v8 = vsel %vm789_vm8, %v785_v31, %v709_v30 }
 0x146   : > { %v781_v32 = vpop.permute.xlu1 %780  ;;  %v723_v60 = vpop.permute.xlu0 %722 }
 0x147   : > { %v819_v19 = vsel %vm814_vm15, %v813_v10, %v781_v32  ;;  %v796_v34 = vsel %vm794_vm9, %v791_v8, %v723_v60 }
 0x148   : > { %v835_v36 = vand.u32 %v834_v33, %v819_v19  ;;  %v801_v37 = vsel %vm799_vm10, %v796_v34, %v737_v22 }
 0x149   : > { %v806_v39 = vsel %vm804_vm12, %v801_v37, %v751_v40 }
 0x14a   : > { %843 = vmatpush.bf16.msra.mxu0 %v835_v36 }
 0x14e   : > { %v779_v1 = vpop.permute.xlu1 %778  ;;  %v765_v3 = vpop.permute.xlu0 %764 }
 0x14f   : > { %v811_v12 = vsel %vm809_vm14, %v806_v39, %v765_v3 }
 0x150   : > { %v816_v42 = vsel %vm814_vm15, %v811_v12, %v779_v1 }
 0x151   : > { %844 = vmatpush.bf16.msra.mxu0 %v816_v42 }
 0x154   : > { %1265 = vmatmul.msk.bf16.vlgmr.msra.gmra.mxu0 %vm827_vm0, %v820_v13 }
 0x156   : > { %v859_v49 = vpop.permute.xlu0 %858  ;;  %v864_v50 = vpop.permute.xlu1 %863 }
 0x1d1   : > { %v846_v45 = vpop.f32.mrf.mxu0 }
 0x1d2   : > { %v847_v23 = vadd.f32 %v846_v45, %v825_v51 }
 0x1d4   : > { %v850_v35 = vmax.f32 %v847_v23, 0.0 }
 0x1d6   : > { %v853_v46 = vpack.c.bf16 %v850_v35, %v850_v35 }
 0x1d8   : > { %v877_v47 = vsel %vm875_vm1, %v853_v46, 0 }
 0x1d9   : > { %v848_v48 = vpop.f32.mrf.mxu0  ;;  %886 = vmatpush.bf16.msra.mxu1 %v877_v47 }
 0x1dc   : > { %1270 = vmatmul.msk.bf16.vlgmr.msra.gmra.mxu1 %vm871_vm2, %v1269_v18 }
 0x259   : > { %v888_v52 = vpop.f32.mrf.mxu1 }
 0x25a   : > { %v889_v28 = vadd.f32 %v888_v52, %v859_v49 }
 0x25c   : > { %913 = vrot.lane.b32.xlu0 %v889_v28, %s1471_s14  ;;  %907 = vrot.lane.b32.xlu1 %v889_v28, %s1472_s15  ;;  %v940_v62 = vrot.slane %v889_v28, 4 }
 0x25d   : > { %895 = vrot.lane.b32.xlu2 %v889_v28, %s1474_s17 }
 0x261   : > { %v890_v54 = vpop.f32.mrf.mxu1 }
 0x262   : > { %v1893_v56 = vadd.f32 %v890_v54, %v864_v50 }
 0x264   : > { %925 = vrot.lane.b32.xlu0 %v889_v28, %s1469_s12  ;;  %919 = vrot.lane.b32.xlu1 %v889_v28, %s2097_s10 }
 0x265   : > { %901 = vrot.lane.b32.xlu2 %v889_v28, %s2098_s13 }
 0x26c   : > { %903 = vrot.lane.b32.xlu0 %v1893_v56, %s2098_s13  ;;  %897 = vrot.lane.b32.xlu1 %v1893_v56, %s1474_s17  ;;  %s1277_s17 = smul.u32 28, %s1450_s22 }
 0x26d   : > { %909 = vrot.lane.b32.xlu2 %v1893_v56, %s1472_s15 }
 0x26e   : > { %s1171_s9 = sadd.s32 %s1446_s21, %s1277_s17 }
 0x26f   : > { %s1271_s22 = sshll.u32 %s1171_s9, 3  ;;  %s1388_s9 = scalar_lea.hbm %s2084_s5, 448 }
 0x270   : > { %s1173_s27 = scalar_lea.hbm %s2084_s5, %s1271_s22 }
 0x271   : > { %s1176_s8 = sshll.u32 %s1173_s27, 4  ;;  %s1177_s8 = int_to_ptr.hbm [resolvable:$true] %s1176_s8 }
 0x272   : > { %s1382_s13 = sshra.s32 %s1177_s8, 4  ;;  %s1383_s13 = int_to_ptr.hbm [resolvable:$true] %s1382_s13 }
 0x273   : > { %p1389_p2 = scmp.lt.s32.totalorder %s1383_s13, %s2084_s5 }
 0x274   : > { %933 = vrot.lane.b32.xlu0 %v1893_v56, %s2099_s16  ;;  %927 = vrot.lane.b32.xlu1 %v1893_v56, %s1469_s12  ;;  %s229_s12 = sand.u32 1, %s1438_s19  }
 0x275   : > { %921 = vrot.lane.b32.xlu2 %v1893_v56, %s2097_s10  ;;  %s1161_s10 = scalar_lea.sflag [#allocation3], %s229_s12 }
 0x27c   : > { %915 = vrot.lane.b32.xlu1 %v1893_v56, %s1471_s14  ;;  %s1935_s14 = smul.u32 112, %s229_s12 }
 0x27d   : > { %931 = vrot.lane.b32.xlu2 %v889_v28, %s2099_s16  ;;  %s1384_s16 = scalar_lea.hbm %s1383_s13, 112 }
 0x27e   : > { %s1955_s15 = scalar_lea.vmem [#allocation2], %s1935_s14  ;;  %p1385_p13 = scmp.ne.s32.totalorder %s1383_s13, %s1384_s16 }
 0x27f   : > { %s1174_s30 = sshll.u32 %s1955_s15, 4  ;;  %p1390_p4 = scmp.lt.s32.totalorder %s1388_s9, %s1384_s16  ;;  %s2025_s30 = int_to_ptr.vmem [resolvable:$true] %s1174_s30 }
 0x280   : > { %p1386_p0 = pnand %p1385_p13, %p1561_p3 }
 0x281   : > { %p1391_p5 = por %p1390_p4, %p1389_p2 }
 0x282   : > { %p1387_p1 = pneg %p1386_p0 }
 0x284   : > { %p1392_p6 = pnand %p1391_p5, %p1387_p1 }
 0x2b7   : > { %v896_v25 = vpop.permute.xlu2 %895 }
 0x2b8   : > { %v952_v53 = vrot.slane %v896_v25, 4 }
 0x2bf   : > { %v902_v57 = vpop.permute.xlu2 %901 }
 0x2c0   : > { %v937_v59 = vrot.slane %v902_v57, 4  ;;  %v941_v63 = vsel %vm454_vm6, %v902_v57, %v940_v62 }
 0x2c1   : > { %v949_v7 = vperm.slane %v941_v63, %v1688_v5 }
 0x2c2   : > { %v939_v2 = vsel %vm454_vm6, %v937_v59, %v889_v28 }
 0x2c3   : > { %v945_v61 = vperm.slane %v939_v2, %v1688_v5  ;;  %v1000_v21 = vrot.slane %v949_v7, 4 }
 0x2c5   : > { %v988_v22 = vrot.slane %v945_v61, 4 }
 0x2c7   : > { %v1910_v58 = vpop.permute.xlu2 %909 }
 0x2c8   : > { %v1062_v20 = vrot.slane %v1910_v58, 4 }
 0x2ce   : > { %v914_v4 = vpop.permute.xlu0 %913  ;;  %v908_v9 = vpop.permute.xlu1 %907 }
 0x2cf   : > { %v950_v11 = vrot.slane %v908_v9, 4  ;;  %v953_v17 = vsel %vm454_vm6, %v908_v9, %v952_v53  ;;  %v1916_v55 = vpop.permute.xlu2 %921  ;;  %v964_v0 = vrot.slane %v914_v4, 4 }
 0x2d0   : > { %v961_v15 = vperm.slane %v953_v17, %v1688_v5 }
 0x2d1   : > { %v951_v14 = vsel %vm454_vm6, %v950_v11, %v896_v25 }
 0x2d2   : > { %v957_v16 = vperm.slane %v951_v14, %v1688_v5  ;;  %v998_v26 = vrot.slane %v961_v15, 4  ;;  %v1001_v27 = vsel %vm454_vm6, %v961_v15, %v1000_v21 }
 0x2d3   : > { %v1009_v32 = vperm.slane %v1001_v27, %v1704_v43 }
 0x2d4   : > { %v986_v24 = vrot.slane %v957_v16, 4  ;;  %v989_v6 = vsel %vm454_vm6, %v957_v16, %v988_v22  ;;  %v999_v34 = vsel %vm454_vm6, %v998_v26, %v949_v7 }
 0x2d5   : > { %v997_v40 = vperm.slane %v989_v6, %v1704_v43  ;;  %v1005_v45 = vperm.slane %v999_v34, %v1704_v43  ;;  %v1048_v46 = vrot.slane %v1009_v32, 4 }
 0x2d6   : > { %v926_v29 = vpop.permute.xlu0 %925  ;;  %v920_v30 = vpop.permute.xlu1 %919  ;;  %v987_v19 = vsel %vm454_vm6, %v986_v24, %v945_v61 }
 0x2d7   : > { %v962_v31 = vrot.slane %v926_v29, 4  ;;  %v932_v33 = vpop.permute.xlu2 %931  ;;  %v965_v60 = vsel %vm454_vm6, %v926_v29, %v964_v0  ;;  %v976_v10 = vrot.slane %v920_v30, 4  ;;  %v993_v38 = vperm.slane %v987_v19, %v1704_v43 }
 0x2d8   : > { %v974_v8 = vrot.slane %v932_v33, 4  ;;  %v973_v37 = vperm.slane %v965_v60, %v1688_v5  ;;  %v1040_v44 = vrot.slane %v997_v40, 4  ;;  %v1044_v63 = vrot.slane %v1005_v45, 4 }
 0x2d9   : > { %v963_v36 = vsel %vm454_vm6, %v962_v31, %v914_v4  ;;  %v977_v3 = vsel %vm454_vm6, %v932_v33, %v976_v10  ;;  %v1036_v25 = vrot.slane %v993_v38, 4  ;;  %v1088_v33 = vrot.slane %v1916_v55, 4 }
 0x2da   : > { %v969_v1 = vperm.slane %v963_v36, %v1688_v5  ;;  %v975_v39 = vsel %vm454_vm6, %v974_v8, %v920_v30  ;;  %v1024_v12 = vrot.slane %v973_v37, 4  ;;  %v985_v13 = vperm.slane %v977_v3, %v1688_v5 }
 0x2db   : > { %v981_v42 = vperm.slane %v975_v39, %v1688_v5 }
 0x2dc   : > { %v1012_v51 = vrot.slane %v969_v1, 4  ;;  %v1022_v35 = vrot.slane %v985_v13, 4  ;;  %v1025_v41 = vsel %vm454_vm6, %v985_v13, %v1024_v12 }
 0x2dd   : > { %v1010_v23 = vrot.slane %v981_v42, 4  ;;  %v1033_v18 = vperm.slane %v1025_v41, %v1704_v43 }
 0x2de   : > { %v1013_v47 = vsel %vm454_vm6, %v981_v42, %v1012_v51  ;;  %v904_v48 = vpop.permute.xlu0 %903  ;;  %v898_v49 = vpop.permute.xlu1 %897  ;;  %v1023_v50 = vsel %vm454_vm6, %v1022_v35, %v973_v37 }
 0x2df   : > { %v1011_v52 = vsel %vm454_vm6, %v1010_v23, %v969_v1  ;;  %v1021_v28 = vperm.slane %v1013_v47, %v1704_v43  ;;  %v1050_v54 = vrot.slane %v904_v48, 4  ;;  %v1029_v59 = vperm.slane %v1023_v50, %v1704_v43 }
 0x2e0   : > { %v1017_v57 = vperm.slane %v1011_v52, %v1704_v43  ;;  %v1049_v62 = vsel %vm454_vm6, %v1033_v18, %v1048_v46  ;;  %v1046_v4 = vrot.slane %v1033_v18, 4  ;;  %v1063_v21 = vsel %vm454_vm6, %v1062_v20, %v898_v49 }
 0x2e1   : > { %v1038_v53 = vrot.slane %v1021_v28, 4  ;;  %v1041_v2 = vsel %vm454_vm6, %v1021_v28, %v1040_v44  ;;  %1153 = vst.msk [vmem:[%s1955_s15 + $0x38] sm:$0xff] %vm782_vm7, %v1049_v62  ;;  %v1042_v11 = vrot.slane %v1029_v59, 4  ;;  %v1051_v17 = vsel %vm454_vm6, %v1050_v54, %v1893_v56 }
 0x2e2   : > { %v1034_v9 = vrot.slane %v1017_v57, 4  ;;  %v1037_v7 = vsel %vm454_vm6, %v1017_v57, %v1036_v25  ;;  %1149 = vst.msk [vmem:[%s1955_s15 + $0x18] sm:$0xff] %vm782_vm7, %v1041_v2  ;;  %v1045_v14 = vsel %vm454_vm6, %v1029_v59, %v1044_v63  ;;  %v1064_v22 = vrot.slane %v898_v49, 4 }
 0x2e3   : > { %v1039_v61 = vsel %vm454_vm6, %v1038_v53, %v997_v40  ;;  %1147 = vst.msk [vmem:[%s1955_s15 + $0x8] sm:$0xff] %vm782_vm7, %v1037_v7  ;;  %v1043_v16 = vsel %vm454_vm6, %v1042_v11, %v1005_v45  ;;  %v1047_v24 = vsel %vm454_vm6, %v1046_v4, %v1009_v32  ;;  %v1057_v26 = vperm.slane %v1051_v17, %v1688_v5 }
 0x2e4   : > { %v1035_v15 = vsel %vm454_vm6, %v1034_v9, %v993_v38  ;;  %1148 = vst.msk [vmem:[%s1955_s15 + $0x10] sm:$0xff] %vm782_vm7, %v1039_v61  ;;  %v1069_v27 = vperm.slane %v1063_v21, %v1688_v5  ;;  %v1065_v0 = vsel %vm454_vm6, %v1910_v58, %v1064_v22  ;;  %v1052_v32 = vrot.slane %v1893_v56, 4 }
 0x2e5   : > { %1146 = vst.msk [vmem:[%s1955_s15] sm:$0xff] %vm782_vm7, %v1035_v15  ;;  %v1073_v6 = vperm.slane %v1065_v0, %v1688_v5  ;;  %v1100_v10 = vrot.slane %v1057_v26, 4 }
 0x2e6   : > { %1150 = vst.msk [vmem:[%s1955_s15 + $0x20] sm:$0xff] %vm782_vm7, %v1043_v16  ;;  %v934_v29 = vpop.permute.xlu0 %933  ;;  %v928_v30 = vpop.permute.xlu1 %927  ;;  %v1098_v60 = vrot.slane %v1069_v27, 4  ;;  %v1053_v58 = vsel %vm454_vm6, %v904_v48, %v1052_v32 }
 0x2e7   : > { %1151 = vst.msk [vmem:[%s1955_s15 + $0x28] sm:$0xff] %vm782_vm7, %v1045_v14  ;;  %v1086_v31 = vrot.slane %v934_v29, 4  ;;  %v1089_v19 = vsel %vm454_vm6, %v934_v29, %v1088_v33  ;;  %v1110_v34 = vrot.slane %v1073_v6, 4  ;;  %v1061_v40 = vperm.slane %v1053_v58, %v1688_v5 }
 0x2e8   : > { %1152 = vst.msk [vmem:[%s1955_s15 + $0x30] sm:$0xff] %vm782_vm7, %v1047_v24  ;;  %v1099_v36 = vsel %vm454_vm6, %v1098_v60, %v1057_v26  ;;  %v1101_v1 = vsel %vm454_vm6, %v1069_v27, %v1100_v10  ;;  %v1097_v56 = vperm.slane %v1089_v19, %v1688_v5  ;;  %v1074_v39 = vrot.slane %v928_v30, 4 }
 0x2e9   : > { %v1087_v8 = vsel %vm454_vm6, %v1086_v31, %v1916_v55  ;;  %v1105_v55 = vperm.slane %v1099_v36, %v1704_v43  ;;  %v1111_v12 = vsel %vm454_vm6, %v1110_v34, %v1061_v40  ;;  %v1109_v20 = vperm.slane %v1101_v1, %v1704_v43 }
 0x2ea   : > { %v1093_v37 = vperm.slane %v1087_v8, %v1688_v5  ;;  %v1128_v45 = vrot.slane %v1097_v56, 4  ;;  %v1115_v35 = vperm.slane %v1111_v12, %v1704_v43 }
 0x2eb   : > { %v1136_v47 = vrot.slane %v1105_v55, 4  ;;  %v1140_v48 = vrot.slane %v1109_v20, 4 }
 0x2ec   : > { %v1116_v38 = vrot.slane %v1093_v37, 4  ;;  %v1144_v25 = vrot.slane %v1115_v35, 4 }
 0x2ee   : > { %v916_v3 = vpop.permute.xlu1 %915 }
 0x2ef   : > { %v1075_v42 = vsel %vm454_vm6, %v1074_v39, %v916_v3  ;;  %v1076_v13 = vrot.slane %v916_v3, 4 }
 0x2f0   : > { %v1081_v51 = vperm.slane %v1075_v42, %v1688_v5 }
 0x2f1   : > { %v1077_v23 = vsel %vm454_vm6, %v928_v30, %v1076_v13 }
 0x2f2   : > { %v1085_v41 = vperm.slane %v1077_v23, %v1688_v5  ;;  %v1117_v44 = vsel %vm454_vm6, %v1116_v38, %v1081_v51  ;;  %v1118_v46 = vrot.slane %v1081_v51, 4 }
 0x2f3   : > { %v1123_v18 = vperm.slane %v1117_v44, %v1704_v43 }
 0x2f4   : > { %v1119_v49 = vsel %vm454_vm6, %v1093_v37, %v1118_v46  ;;  %v1129_v52 = vsel %vm454_vm6, %v1128_v45, %v1085_v41 }
 0x2f5   : > { %v1127_v28 = vperm.slane %v1119_v49, %v1704_v43  ;;  %v1133_v5 = vperm.slane %v1129_v52, %v1704_v43  ;;  %v1134_v50 = vrot.slane %v1123_v18, 4  ;;  %v1137_v54 = vsel %vm454_vm6, %v1123_v18, %v1136_v47 }
 0x2f6   : > { %1155 = vst.msk [vmem:[%s1955_s15 + $0x48] sm:$0xff] %vm782_vm7, %v1137_v54 }
 0x2f7   : > { %v1135_v57 = vsel %vm454_vm6, %v1134_v50, %v1105_v55  ;;  %v1138_v59 = vrot.slane %v1127_v28, 4  ;;  %v1141_v62 = vsel %vm454_vm6, %v1127_v28, %v1140_v48  ;;  %v1142_v63 = vrot.slane %v1133_v5, 4 }
 0x2f8   : > { %1154 = vst.msk [vmem:[%s1955_s15 + $0x40] sm:$0xff] %vm782_vm7, %v1135_v57  ;;  %v1145_v2 = vsel %vm454_vm6, %v1133_v5, %v1144_v25 }
 0x2f9   : > { %v1139_v43 = vsel %vm454_vm6, %v1138_v59, %v1109_v20  ;;  %v1143_v53 = vsel %vm454_vm6, %v1142_v63, %v1115_v35  ;;  %1157 = vst.msk [vmem:[%s1955_s15 + $0x58] sm:$0xff] %vm782_vm7, %v1141_v62 }
 0x2fa   : > { %1156 = vst.msk [vmem:[%s1955_s15 + $0x50] sm:$0xff] %vm782_vm7, %v1139_v43 }
 0x2fb   : > { %1158 = vst.msk [vmem:[%s1955_s15 + $0x60] sm:$0xff] %vm782_vm7, %v1143_v53 }
 0x2fc   : > { %1159 = vst.msk [vmem:[%s1955_s15 + $0x68] sm:$0xff] %vm782_vm7, %v1145_v2 }
 0x2fd   : > { %1395 = shalt.err (!%p1392_p6)
}
 0x2fe   : > { %s1477_s12 = smov 128   ;;  %s1478_s15 = smov 256  }
 0x2ff   : > { %s1479_s26 = smov 8  }
 0x300   : > { %1278 = dma.vmem_to_hbm [thread:$0]  (%p1561_p3), %s2025_s30, 1792, %s1177_s8, %s1161_s10, %s1477_s12, %s1478_s15, %s1479_s26  }
 0x301 PF: > { %p1284_p7 = scmp.ge.s32.totalorder %s1462_s25, 2  ;;  %s1191_s27 = sand.u32 1, %s1434_s18  }
 0x302   : > { %s1192_s13 = scalar_lea.sflag [#allocation3], %s1191_s27 }
 0x303   : > { %p1281_p9 = pnand %p1284_p7, %p1570_p8 }
 0x305   : > { %p1282_p10 = pneg %p1281_p9 }
 0x307   : > { %1429 = dma.done.wait (%p1282_p10), %s1192_s13, 1792  }
 0x308   : > { %1431 = vsyncadd (%p1282_p10), %s1192_s13, 4294965504  ;;  %s18_s25 = sadd.s32 1, %s1462_s25   ;;  %s2100_s18 = smov %s1438_s19 }
 0x309   : > { %p15_p11 = scmp.ge.s32.totalorder %s18_s25, 6   ;;  %s2101_s19 = smov %s1442_s20 }
 0x30a   : > { %s2102_s20 = smov %s1579_s11  ;;  %s2103_s21 = smov %s1454_s23 }
 0x30b   : > { %s2104_s22 = smov %s1458_s24  ;;  %s2105_s23 = smov %s2108_s28 }
 0x30c   : > { %s2106_s24 = smov %s2112_s29  ;;  %17 = sbr.rel (!%p15_p11) target bundleno = 5 (0x5), region = 76 }
 0x311   :  { %1198 = vsyncpa [#allocation3], 1 }
 0x312   :  { %1200 = vsyncpa [#allocation3 + $0x1], 1 }

</bundles_post_ra>
